<compile_context>
chip_gen: v5e
topology: v5e:2x2
jax: 0.10.0
libtpu: 0.0.40
codegen_flags: <defaults>
</compile_context>

<pallas_src>
import jax
import jax.numpy as jnp
from jax import lax
from jax.experimental import pallas as pl
from jax.experimental.pallas import tpu as pltpu


def head_kernel(x_ref, wqkv_ref, o_ref):
    # x_ref: (block_b, T, C)   wqkv_ref: (C, 3H)   o_ref: (block_b, T, H)
    bb, t, c = x_ref.shape
    h = wqkv_ref.shape[1] // 3
    mm_dtype = wqkv_ref.dtype          # bf16 if the wrapper cast the weights (v6e/v7x)

    # Fused projection: contract over C, no explicit reshape (effective M = bb*T,
    # N = 3H on the MXU). Scale 1/C**2 is already folded into the Wk columns.
    qkv = lax.dot_general(
        x_ref[...].astype(mm_dtype), wqkv_ref[...],
        dimension_numbers=(((2,), (0,)), ((), ())),
        preferred_element_type=jnp.float32)                     # (bb, T, 3H)

    k = qkv[..., 0 * h:1 * h]
    q = qkv[..., 1 * h:2 * h]
    v = qkv[..., 2 * h:3 * h]

    # scores = k @ q^T (batched). The contraction handles the transposed operand,
    # so there is no explicit XLU transpose / relayout.
    s = lax.dot_general(
        k.astype(mm_dtype), q.astype(mm_dtype),
        dimension_numbers=(((2,), (2,)), ((0,), (0,))),
        preferred_element_type=jnp.float32)                     # (bb, T, T)

    # Causal mask (tril). Finite min instead of -inf so fully-masked/padded rows
    # cannot produce NaN through the softmax.
    row = lax.broadcasted_iota(jnp.int32, (t, t), 0)
    col = lax.broadcasted_iota(jnp.int32, (t, t), 1)
    s = jnp.where((col <= row)[None], s, jnp.finfo(jnp.float32).min)

    # Softmax in f32: exp on the EUP; normalisation via EUP reciprocal (no VALU divide).
    m = jnp.max(s, axis=-1, keepdims=True)
    e = jnp.exp(s - m)
    p = e * pl.reciprocal(jnp.sum(e, axis=-1, keepdims=True), approx=True)

    out = lax.dot_general(
        p.astype(mm_dtype), v.astype(mm_dtype),
        dimension_numbers=(((2,), (1,)), ((0,), (0,))),
        preferred_element_type=jnp.float32)                     # (bb, T, H)
    o_ref[...] = out.astype(o_ref.dtype)


def head_forward(x, wk, wq, wv, *, block_b=None, matmul_dtype=None):
    """x: (B, T, C); wk/wq/wv: (C, H) (pre-transposed nn.Linear weights).

    matmul_dtype: set to jnp.bfloat16 on v6e/v7x for bf16 MXU inputs with f32
    accumulation; defaults to x.dtype (f32) for exact-ish numerics.
    """
    B, T, C = x.shape
    H = wk.shape[1]
    mm_dtype = x.dtype if matmul_dtype is None else matmul_dtype

    # Fold the 1/C**2 score scale into Wk (weight-sized, one-time, grid-invariant),
    # then fuse the three projection weights -> one (C, 3H) operand, one DMA.
    wqkv = jnp.concatenate([wk * (1.0 / (C ** 2)), wq, wv], axis=1).astype(mm_dtype)

    if block_b is None:
        # Batch several sequences per grid step: ~hundreds of MXU M rows per
        # projection, bounded so the resident (bb, T, T) f32 score slab stays small.
        target_rows = 512
        vmem_cap = max(1, (8 << 20) // max(4 * T * T, 1))       # ~8 MiB of scores
        target = max(1, min(target_rows // max(T, 1), vmem_cap))
        block_b = max(d for d in range(1, B + 1) if B % d == 0 and d <= target)
    grid = (B // block_b,)

    return pl.pallas_call(
        head_kernel,
        out_shape=jax.ShapeDtypeStruct((B, T, H), x.dtype),
        grid_spec=pltpu.PrefetchScalarGridSpec(
            num_scalar_prefetch=0,
            grid=grid,
            in_specs=[
                pl.BlockSpec((block_b, T, C), lambda b: (b, 0, 0)),
                pl.BlockSpec((C, 3 * H), lambda b: (0, 0)),
            ],
            out_specs=pl.BlockSpec((block_b, T, H), lambda b: (b, 0, 0)),
        ),
        compiler_params=pltpu.CompilerParams(
            dimension_semantics=("parallel",)),
    )(x, wqkv)


def head_reference(x, wk, wq, wv):
    """Plain-JAX reference mirroring the PyTorch forward (eval mode)."""
    B, T, C = x.shape
    k = x @ wk
    q = x @ wq
    v = x @ wv
    w = jnp.einsum("bth,bsh->bts", k, q) / (C ** 2)
    mask = jnp.tril(jnp.ones((T, T), dtype=bool))
    w = jnp.where(mask, w, -jnp.inf)
    w = jax.nn.softmax(w, axis=-1)
    return w @ v


if __name__ == "__main__":
    # batch=2, seq (block_size)=8, embedding_dim=32, head_dim=16.
    B, T, C, H = 2, 8, 32, 16

    key = jax.random.PRNGKey(0)
    kx, kk, kq, kv = jax.random.split(key, 4)

    x = jax.random.normal(kx, (B, T, C), dtype=jnp.float32)
    # nn.Linear(embedding_dim, head_dim, bias=False) weights, stored transposed (C, H).
    wk = jax.random.normal(kk, (C, H), dtype=jnp.float32) * 0.02
    wq = jax.random.normal(kq, (C, H), dtype=jnp.float32) * 0.02
    wv = jax.random.normal(kv, (C, H), dtype=jnp.float32) * 0.02

    out = jax.block_until_ready(head_forward(x, wk, wq, wv))
    ref = head_reference(x, wk, wq, wv)

    assert out.shape == (B, T, H)
    # Tolerance accounts for the approx EUP reciprocal in the softmax normalisation.
    assert jnp.allclose(out, ref, atol=1e-3, rtol=1e-3), float(jnp.max(jnp.abs(out - ref)))

    print("KERNEL_OK")
</pallas_src>

<mosaic_0001>
module attributes {stable_mosaic.version = 11 : i64} {
  func.func @head_kernel(%arg0: i32, %arg1: memref<2x8x32xf32, #tpu.memory_space<vmem>>, %arg2: memref<32x48xf32, #tpu.memory_space<vmem>>, %arg3: memref<2x8x16xf32, #tpu.memory_space<vmem>>) attributes {dimension_semantics = [#tpu.dimension_semantics<parallel>], iteration_bounds = array<i64: 1>, scalar_prefetch = 0 : i64, scratch_operands = 0 : i64, tpu.core_type = #tpu.core_type<tc>, window_params = [{transform_indices = @transform_0, window_bounds = array<i64: 2, 8, 32>}, {pipeline_mode = #tpu.pipeline_mode<synchronous>, transform_indices = @transform_1, window_bounds = array<i64: 32, 48>}, {transform_indices = @transform_2, window_bounds = array<i64: 2, 8, 16>}]} {
    %c0 = arith.constant 0 : index
    %c0_0 = arith.constant 0 : index
    %c0_1 = arith.constant 0 : index
    %0 = vector.load %arg1[%c0, %c0_0, %c0_1] : memref<2x8x32xf32, #tpu.memory_space<vmem>>, vector<2x8x32xf32>
    %c0_2 = arith.constant 0 : index
    %c0_3 = arith.constant 0 : index
    %1 = vector.load %arg2[%c0_2, %c0_3] : memref<32x48xf32, #tpu.memory_space<vmem>>, vector<32x48xf32>
    %cst = arith.constant dense<0.000000e+00> : vector<2x8x48xf32>
    %2 = tpu.matmul %0, %1, %cst {dimension_numbers = #tpu.dot_dimension_numbers<[2], [0], [0, 1], [1], [0, 0, 0, 1, 1, 1], [], []>} : vector<2x8x32xf32>, vector<32x48xf32>, vector<2x8x48xf32> -> vector<2x8x48xf32>
    %3 = vector.extract_strided_slice %2 {offsets = [0, 0, 0], sizes = [2, 8, 16], strides = [1, 1, 1]} : vector<2x8x48xf32> to vector<2x8x16xf32>
    %4 = vector.extract_strided_slice %2 {offsets = [0, 0, 16], sizes = [2, 8, 16], strides = [1, 1, 1]} : vector<2x8x48xf32> to vector<2x8x16xf32>
    %5 = vector.extract_strided_slice %2 {offsets = [0, 0, 32], sizes = [2, 8, 16], strides = [1, 1, 1]} : vector<2x8x48xf32> to vector<2x8x16xf32>
    %cst_4 = arith.constant dense<0.000000e+00> : vector<2x8x8xf32>
    %6 = tpu.matmul %3, %4, %cst_4 {dimension_numbers = #tpu.dot_dimension_numbers<[2], [2], [1], [1], [0, 0, 0, 1, 1, 1], [0], [0]>} : vector<2x8x16xf32>, vector<2x8x16xf32>, vector<2x8x8xf32> -> vector<2x8x8xf32>
    %7 = tpu.iota {dimensions = array<i32: 0>} : vector<8x8xi32>
    %8 = tpu.iota {dimensions = array<i32: 1>} : vector<8x8xi32>
    %9 = arith.cmpi sle, %8, %7 : vector<8x8xi32>
    %10 = vector.shape_cast %9 : vector<8x8xi1> to vector<1x8x8xi1>
    %cst_5 = arith.constant -3.40282347E+38 : f32
    %11 = vector.shape_cast %10 : vector<1x8x8xi1> to vector<1x8x8xi1>
    %12 = vector.broadcast %11 : vector<1x8x8xi1> to vector<2x8x8xi1>
    %13 = vector.broadcast %cst_5 : f32 to vector<2x8x8xf32>
    %14 = arith.select %12, %6, %13 : vector<2x8x8xi1>, vector<2x8x8xf32>
    %cst_6 = arith.constant dense<0xFF800000> : vector<2x8xf32>
    %15 = vector.multi_reduction <maximumf>, %14, %cst_6 [2] : vector<2x8x8xf32> to vector<2x8xf32>
    %16 = vector.shape_cast %15 : vector<2x8xf32> to vector<2x8x1xf32>
    %17 = vector.broadcast %16 : vector<2x8x1xf32> to vector<2x8x8xf32>
    %18 = arith.subf %14, %17 : vector<2x8x8xf32>
    %19 = math.exp %18 : vector<2x8x8xf32>
    %cst_7 = arith.constant dense<0.000000e+00> : vector<2x8xf32>
    %20 = vector.multi_reduction <add>, %19, %cst_7 [2] : vector<2x8x8xf32> to vector<2x8xf32>
    %21 = vector.shape_cast %20 : vector<2x8xf32> to vector<2x8x1xf32>
    %22 = tpu.reciprocal %21 {approx = true} : vector<2x8x1xf32> -> vector<2x8x1xf32>
    %23 = vector.broadcast %22 : vector<2x8x1xf32> to vector<2x8x8xf32>
    %24 = arith.mulf %19, %23 : vector<2x8x8xf32>
    %cst_8 = arith.constant dense<0.000000e+00> : vector<2x8x16xf32>
    %25 = tpu.matmul %24, %5, %cst_8 {dimension_numbers = #tpu.dot_dimension_numbers<[2], [1], [1], [2], [0, 0, 0, 1, 1, 2], [0], [0]>} : vector<2x8x8xf32>, vector<2x8x16xf32>, vector<2x8x16xf32> -> vector<2x8x16xf32>
    %c0_9 = arith.constant 0 : index
    %c0_10 = arith.constant 0 : index
    %c0_11 = arith.constant 0 : index
    %26 = vector.load %arg3[%c0_9, %c0_10, %c0_11] : memref<2x8x16xf32, #tpu.memory_space<vmem>>, vector<2x8x16xf32>
    tpu.vector_store %arg3[%c0_9, %c0_10, %c0_11], %25 {strides = array<i32>} : memref<2x8x16xf32, #tpu.memory_space<vmem>>, vector<2x8x16xf32>,
    return
  }
  func.func @transform_0(%arg0: i32) -> (i32, i32, i32) {
    %c0_i32 = arith.constant 0 : i32
    %c0_i32_0 = arith.constant 0 : i32
    %c0_i32_1 = arith.constant 0 : i32
    return %arg0, %c0_i32, %c0_i32_0 : i32, i32, i32
  }
  func.func @transform_1(%arg0: i32) -> (i32, i32) {
    %c0_i32 = arith.constant 0 : i32
    %c0_i32_0 = arith.constant 0 : i32
    %c0_i32_1 = arith.constant 0 : i32
    return %c0_i32, %c0_i32_0 : i32, i32
  }
  func.func @transform_2(%arg0: i32) -> (i32, i32, i32) {
    %c0_i32 = arith.constant 0 : i32
    %c0_i32_0 = arith.constant 0 : i32
    %c0_i32_1 = arith.constant 0 : i32
    return %arg0, %c0_i32, %c0_i32_0 : i32, i32, i32
  }
}

</mosaic_0001>

<bundles_post_ra>
// kernel: tpu_custom_call.1
= control target key start
LH: loop header
LB: loop body
LE: loop exit
PB: predicated region body
PF: predicated region fallthrough
CT: control target
= control target key end

     0   :  { %7 = vsyncpa [#allocation3], 0  ;;  %s394_s0 = inlined_call_operand.hbm [shape: f32[2,8,32], index: 0, kind: input, shape index: {}]   ;;  %s395_s1 = inlined_call_operand.hbm [shape: f32[32,48], index: 1, kind: input, shape index: {}]   ;;  %s396_s2 = inlined_call_operand.hbm [shape: f32[2,8,16], index: 2, kind: output, shape index: {}]  }
   0x1   :  { %8 = vsyncpa [#allocation6], 0 }
   0x2   :  { %9 = vsyncpa [#allocation4], 0  ;;  %s14_s11 = sshll.u32 %s394_s0, 4  ;;  %s342_s12 = smov [#allocation2]   ;;  %s15_s11 = int_to_ptr.hbm [resolvable:$true] %s14_s11 }
   0x3   :  { %s16_s13 = sshll.u32 %s342_s12, 4  ;;  %s27_s16 = sshll.u32 %s395_s1, 4  ;;  %s17_s13 = int_to_ptr.vmem [resolvable:$true] %s16_s13  ;;  %s28_s16 = int_to_ptr.hbm [resolvable:$true] %s27_s16 }
   0x4   :  { %s343_s17 = smov 128   ;;  %s344_s18 = smov 8  }
   0x5   :  { %22 = dma.hbm_to_vmem [thread:$0]  %s15_s11, 256, %s17_s13, [#allocation3], %s343_s17, %s343_s17, %s344_s18  }
   0x6   :  { %s345_s19 = smov [#allocation5]  }
   0x7   :  { %s29_s20 = sshll.u32 %s345_s19, 4  ;;  %s30_s20 = int_to_ptr.vmem [resolvable:$true] %s29_s20 }
   0x8   :  { %35 = dma.hbm_to_vmem [thread:$0]  %s28_s16, 512, %s30_s20, [#allocation6], %s343_s17, %s343_s17, %s344_s18  }
   0x9   :  { %336 = dma.done.wait [#allocation3], 256  }
   0xa   :  { %337 = vsyncadd [#allocation3], 4294967040 }
   0xb   :  { %338 = dma.done.wait [#allocation6], 512  }
   0xc   :  { %339 = vsyncadd [#allocation6], 4294966784  ;;  %v49_v0 = vld [vmem:[#allocation5 + $0x18] sm:$0xff]  ;;  %v48_v1 = vld [vmem:[#allocation5 + $0x10] sm:$0xff]  ;;  %vm50_vm0 = vcmask 261120   ;;  %s346_s0 = smov 112   ;;  %v135_v11 = vlaneseq }
   0xd   :  { %69 = vmatpush.msra.mxu0 %v49_v0  ;;  %v47_v2 = vld [vmem:[#allocation5 + $0x8] sm:$0xff]  ;;  %v46_v3 = vld [vmem:[#allocation5] sm:$0xff]  ;;  %v44_v4 = vld [vmem:[#allocation2] sm:$0xff]  ;;  %s347_s1 = smov 96   ;;  %vm83_vm1 = vcmask 130048   ;;  %vm144_vm3 = vcmask 64512  }
   0xe   :  { %v45_v5 = vld [vmem:[#allocation2 + $0x8] sm:$0xff]  ;;  %v136_v12 = vshrl.u32 %v135_v11, 7  ;;  %v138_v13 = vand.u32 127, %v135_v11  ;;  %s348_s21 = smov [#allocation7]   ;;  %s227_s25 = sshll.u32 %s396_s2, 4  ;;  %s228_s25 = int_to_ptr.hbm [resolvable:$true] %s227_s25 }
   0xf   :  { %70 = vmatpush.msra.mxu0 %v48_v1  ;;  %s225_s22 = sshll.u32 %s348_s21, 4  ;;  %s226_s22 = int_to_ptr.vmem [resolvable:$true] %s225_s22 }
  0x10   :  { %vm139_vm2 = vcmp.le.s32.totalorder %v138_v13, %v136_v12 }
  0x11   :  { %71 = vmatpush.msra.mxu0 %v47_v2 }
  0x13   :  { %72 = vmatpush.msra.mxu0 %v46_v3 }
  0x14   :  { %241 = vmatmul.msk.f32.vlgmr.msra.gmra.mxu0 %vm50_vm0, %v44_v4 }
  0x1c   :  { %242 = vmatmul.msk.f32.gmra.mxu0 %vm50_vm0, %v45_v5 }
  0x91   :  { %v74_v6 = vpop.f32.mrf.mxu0 }
  0x92   :  { %81 = vrot.lane.b32.xlu0 %v74_v6, %s346_s0 }
  0x99   :  { %v77_v7 = vpop.f32.mrf.mxu0 }
  0x9a   :  { %109 = vrot.lane.b32.xlu0 %v77_v7, %s346_s0 }
  0xa2   :  { %167 = vrot.lane.b32.xlu0 %v74_v6, %s347_s1 }
 0x104   :  { %v82_v8 = vpop.permute.xlu0 %81 }
 0x105   :  { %243 = vmatpush.xpose.msk.msra.mxu1 %vm83_vm1, %v82_v8 }
 0x108   :  { %244 = vmatmul.msk.f32.vlgmr.msra.gmra.mxu1 %vm83_vm1, %v74_v6 }
 0x10c   :  { %v110_v9 = vpop.permute.xlu0 %109 }
 0x10d   :  { %245 = vmatpush.xpose.msk.msra.mxu2 %vm83_vm1, %v110_v9 }
 0x110   :  { %246 = vmatmul.msk.f32.vlgmr.msra.gmra.mxu2 %vm83_vm1, %v77_v7 }
 0x114   :  { %v168_v10 = vpop.permute.xlu0 %167 }
 0x115   :  { %188 = vmatpush.msra.mxu3 %v168_v10 }
 0x185   :  { %v105_v14 = vpop.f32.mrf.mxu1 }
 0x186   :  { %v142_v15 = vsel %vm139_vm2, %v105_v14, -3.4028235e+38 }
 0x187   :  { %v145_v16 = vsel %vm144_vm3, %v142_v15, -inf }
 0x188   :  { %146 = vmax.xlane.f32.xlu1 %v145_v16 }
 0x193   :  { %v132_v17 = vpop.f32.mrf.mxu2 }
 0x194   :  { %v143_v18 = vsel %vm139_vm2, %v132_v17, -3.4028235e+38 }
 0x195   :  { %v148_v19 = vsel %vm144_vm3, %v143_v18, -inf }
 0x196   :  { %149 = vmax.xlane.f32.xlu1 %v148_v19 }
 0x1af   :  { %193 = vrot.lane.b32.xlu1 %v77_v7, %s347_s1 }
 0x1fb   :  { %v147_v20 = vpop.xlane.xlu1 %146 }
 0x1fc   :  { %v151_v21 = vsub.f32 %v142_v15, %v147_v20 }
 0x1fe   :  { %v153_v22 = vmul.f32 1.442695, %v151_v21 }
 0x200   :  { %256 = vpow2.f32 %v153_v22 }
 0x206   :  { %v257_v23 = vpop.eup %256 }
 0x207   :  { %v157_v24 = vsel %vm144_vm3, %v257_v23, 0.0 }
 0x208   :  { %158 = vadd.xlane.f32.xlu2 %v157_v24 }
 0x209   :  { %v150_v25 = vpop.xlane.xlu1 %149 }
 0x20a   :  { %v152_v26 = vsub.f32 %v143_v18, %v150_v25 }
 0x20c   :  { %v155_v27 = vmul.f32 1.442695, %v152_v26 }
 0x20e   :  { %258 = vpow2.f32 %v155_v27 }
 0x214   :  { %v259_v28 = vpop.eup %258 }
 0x215   :  { %v160_v29 = vsel %vm144_vm3, %v259_v28, 0.0 }
 0x216   :  { %161 = vadd.xlane.f32.xlu2 %v160_v29 }
 0x221   :  { %v194_v30 = vpop.permute.xlu1 %193 }
 0x222   :  { %214 = vmatpush.msrb.mxu3 %v194_v30 }
 0x27b   :  { %v159_v31 = vpop.xlane.xlu2 %158 }
 0x27c   :  { %260 = vrcp.f32 %v159_v31 }
 0x282   :  { %v261_v32 = vpop.eup %260 }
 0x283   :  { %v165_v33 = vmul.f32 %v261_v32, %v257_v23 }
 0x285   :  { %247 = vmatmul.msk.f32.vlgmr.msra.gmra.mxu3 %vm144_vm3, %v165_v33 }
 0x289   :  { %v162_v34 = vpop.xlane.xlu2 %161 }
 0x28a   :  { %262 = vrcp.f32 %v162_v34 }
 0x290   :  { %v263_v35 = vpop.eup %262 }
 0x291   :  { %v166_v36 = vmul.f32 %v263_v35, %v259_v28 }
 0x293   :  { %248 = vmatmul.msk.f32.vlgmr.msrb.gmra.mxu3 %vm144_vm3, %v166_v36 }
 0x308   :  { %v190_v37 = vpop.f32.mrf.mxu3 }
 0x309   :  { %219 = vst.msk [vmem:[#allocation7] sm:$0xff] %vm83_vm1, %v190_v37 }
 0x316   :  { %v216_v38 = vpop.f32.mrf.mxu3 }
 0x317   :  { %220 = vst.msk [vmem:[#allocation7 + $0x8] sm:$0xff] %vm83_vm1, %v216_v38 }
 0x318   :  { %233 = dma.vmem_to_hbm [thread:$0]  %s226_s22, 256, %s228_s25, [#allocation4], %s343_s17, %s343_s17, %s344_s18  }
 0x319   :  { %340 = dma.done.wait [#allocation4], 256  }
 0x31a   :  { %341 = vsyncadd [#allocation4], 4294967040 }
 0x31b   :  { %238 = vsyncpa [#allocation3], 1 }
 0x31c   :  { %239 = vsyncpa [#allocation6], 1 }
 0x31d   :  { %240 = vsyncpa [#allocation4], 1 }

</bundles_post_ra>
